<compile_context>
chip_gen: v7x
topology: tpu7x:2x2x1
jax: 0.10.0
libtpu: 0.0.40
codegen_flags: <defaults>
</compile_context>

<pallas_src>
import math
from functools import partial

import numpy as np
import jax
import jax.numpy as jnp
from jax.experimental import pallas as pl
from jax.experimental.pallas import tpu as pltpu


def _round_up(n, m):
    return ((n + m - 1) // m) * m


# ----------------------------------------------------------------------------
# One-time weight preprocessing (all outside the kernel)
# ----------------------------------------------------------------------------
def _conv_toeplitz(w, b, h_in, w_in, stride, out_order, in_rows):
    """Lower a VALID Conv2d to a dense (in_rows, round_up(out,128)) matmul weight.

    w: (KH, KW, Cin, Cout) HWIO, b: (Cout,).
    Input rows are flattened as (h, w, cin); output columns as:
      "hwc": (ho, wo, cout)  -- feeds the next conv layer
      "hcw": (ho, cout, wo)  -- torch transpose(1,2)+view layout
    Output columns are zero-padded at the END of the flat index space to a
    multiple of 128 lanes, so a chained layer's (zero) rows align index-for-
    index with this layer's padded columns.
    """
    w = np.asarray(w, np.float32)
    b = np.asarray(b, np.float32)
    kh, kw, cin, cout = w.shape
    ho_n = (h_in - kh) // stride + 1
    wo_n = (w_in - kw) // stride + 1
    out_cols = ho_n * wo_n * cout
    cols_pad = _round_up(out_cols, 128)

    g = np.meshgrid(np.arange(ho_n), np.arange(wo_n), np.arange(kh),
                    np.arange(kw), np.arange(cin), np.arange(cout), indexing="ij")
    ho, wo, ki, kj, ci, co = [a.ravel() for a in g]
    rows = ((ho * stride + ki) * w_in + (wo * stride + kj)) * cin + ci
    if out_order == "hwc":
        cols = (ho * wo_n + wo) * cout + co
        bias_real = np.tile(b, ho_n * wo_n)
    else:  # "hcw"
        cols = (ho * cout + co) * wo_n + wo
        bias_real = np.tile(np.repeat(b, wo_n), ho_n)

    wbig = np.zeros((in_rows, cols_pad), np.float32)
    wbig[rows, cols] = w[ki, kj, ci, co]
    bias = np.zeros((cols_pad,), np.float32)
    bias[:out_cols] = bias_real
    return wbig, bias, ho_n, wo_n, cols_pad


def prepare_encode_params(params, t_in, f_in):
    """Pack convs as padded Toeplitz matmuls + GRU gates into ONE f32 buffer."""
    conv = params["conv"]
    n_conv = len(conv)
    in_cols = _round_up(t_in * f_in, 128)

    pieces = []               # (name, 2D np array)
    conv_cols = []
    h_cur, w_cur = t_in, f_in
    rows_cur = in_cols
    c_out = 1
    for li, (w, b, s) in enumerate(conv):
        order = "hcw" if li == n_conv - 1 else "hwc"
        wbig, bias, h_cur, w_cur, cpad = _conv_toeplitz(w, b, h_cur, w_cur, s,
                                                        order, rows_cur)
        pieces.append((f"w{li}", wbig))
        pieces.append((f"b{li}", bias[None, :]))
        conv_cols.append(cpad)
        rows_cur = cpad
        c_out = np.asarray(w).shape[-1]

    t_out = h_cur                        # conv time length T'
    feat = c_out * w_cur                 # GRU input size per step = C' * F'
    c_last_pad = conv_cols[-1]

    assert len(params["rnn"]) == 1, "fused kernel supports a single GRU layer"
    w_ih, b_ih, w_hh, b_hh = [np.asarray(a, np.float32) for a in params["rnn"][0]]
    hdim = w_hh.shape[1]
    assert w_ih.shape == (3 * hdim, feat)
    gpad = _round_up(3 * hdim, 128)      # per-step packed gate width (r|z|n|pad)

    # PyTorch gate order in w_ih/w_hh rows: [r; z; n].  Pack as (feat,3H)/(H,3H).
    wi_g = np.concatenate([w_ih[g * hdim:(g + 1) * hdim, :].T for g in range(3)], 1)
    wh_g = np.concatenate([w_hh[g * hdim:(g + 1) * hdim, :].T for g in range(3)], 1)
    # Fold b_ir+b_hr and b_iz+b_hz into the hoisted input projection; keep b_hn
    # on the hh side (it sits inside r*(...)).
    bi_g = np.concatenate([b_ih[0:hdim] + b_hh[0:hdim],
                           b_ih[hdim:2 * hdim] + b_hh[hdim:2 * hdim],
                           b_ih[2 * hdim:3 * hdim]])
    bh_g = np.zeros((gpad,), np.float32)
    bh_g[2 * hdim:3 * hdim] = b_hh[2 * hdim:3 * hdim]

    # Block-diagonal input projection: ONE dot computes x_t @ W_i + b for all T'.
    wi_block = np.zeros((c_last_pad, t_out * gpad), np.float32)
    bi_block = np.zeros((t_out * gpad,), np.float32)
    for t in range(t_out):
        wi_block[t * feat:(t + 1) * feat, t * gpad:t * gpad + 3 * hdim] = wi_g
        bi_block[t * gpad:t * gpad + 3 * hdim] = bi_g

    wh_pack = np.zeros((hdim, gpad), np.float32)
    wh_pack[:, :3 * hdim] = wh_g

    pieces += [("wi", wi_block), ("bi", bi_block[None, :]),
               ("wh", wh_pack), ("bh", bh_g[None, :])]

    # Pack everything into ONE contiguous f32 buffer (2 input DMAs total:
    # x + weights).  Each sub-block starts on an 8-row boundary; common lane
    # width is a multiple of 128.
    lane_w = _round_up(max(p.shape[1] for _, p in pieces), 128)
    offsets, row = {}, 0
    for name, p in pieces:
        offsets[name] = row
        row += _round_up(p.shape[0], 8)
    total_rows = _round_up(row, 8)
    buf = np.zeros((total_rows, lane_w), np.float32)
    for name, p in pieces:
        r0 = offsets[name]
        buf[r0:r0 + p.shape[0], :p.shape[1]] = p

    dims = dict(n_conv=n_conv, in_cols=in_cols, conv_cols=tuple(conv_cols),
                t_out=t_out, hdim=hdim, gpad=gpad, off=offsets)
    return dict(wbuf=jnp.asarray(buf), dims=dims, t_out=t_out, hdim=hdim,
                in_feat=t_in * f_in, in_cols=in_cols)


# ----------------------------------------------------------------------------
# The single fused Pallas kernel: conv stack + reshape + GRU
# ----------------------------------------------------------------------------
def _encode_kernel(x_ref, w_ref, o_ref, *, dims):
    off = dims["off"]
    n_conv = dims["n_conv"]
    conv_cols = dims["conv_cols"]
    t_out, hdim, gpad = dims["t_out"], dims["hdim"], dims["gpad"]

    # ---- Conv2d+ReLU stack: each layer is ONE dense MXU matmul -------------
    h = x_ref[...]                                            # (B, in_cols)
    rows = dims["in_cols"]
    for li in range(n_conv):
        cols = conv_cols[li]
        w = w_ref[off[f"w{li}"]:off[f"w{li}"] + rows, 0:cols]
        b = w_ref[off[f"b{li}"]:off[f"b{li}"] + 1, 0:cols]
        h = jnp.maximum(jnp.dot(h, w, preferred_element_type=jnp.float32) + b, 0.0)
        rows = cols
    # h: (B, conv_cols[-1]); time block t lives at columns [t*feat,(t+1)*feat)
    # already in torch transpose(1,2)+view order; padding columns are exactly 0.

    # ---- GRU input projection for ALL time steps (hoisted, one dot) --------
    wi = w_ref[off["wi"]:off["wi"] + rows, 0:t_out * gpad]
    bi = w_ref[off["bi"]:off["bi"] + 1, 0:t_out * gpad]
    gx = jnp.dot(h, wi, preferred_element_type=jnp.float32) + bi   # (B, T'*128)

    wh = w_ref[off["wh"]:off["wh"] + hdim, 0:gpad]                 # (H, 128)
    bh = w_ref[off["bh"]:off["bh"] + 1, 0:gpad]                    # (1, 128)

    bsz = h.shape[0]
    bh_b = jnp.broadcast_to(bh, (bsz, gpad))   # hoisted: no per-step broadcast
    hs = jnp.zeros((bsz, hdim), jnp.float32)
    outs = []
    for t in range(t_out):                     # fully unrolled (T'=3)
        # serial chain per step: ONE matmul + EUP activations
        gh = jnp.dot(hs, wh, preferred_element_type=jnp.float32) + bh_b
        gxt = gx[:, t * gpad:(t + 1) * gpad]   # 128-lane-aligned slice
        rz = gxt + gh                          # r/z pre-activations (biases pre-folded)
        r = jax.nn.sigmoid(rz[:, 0:hdim])
        z = jax.nn.sigmoid(rz[:, hdim:2 * hdim])
        n = jnp.tanh(gxt[:, 2 * hdim:3 * hdim] + r * gh[:, 2 * hdim:3 * hdim])
        hs = (1.0 - z) * n + z * hs
        outs.append(hs)
    # ONE lane-concatenated store instead of three masked 32-lane stores.
    o_ref[...] = jnp.concatenate(outs, axis=1).astype(o_ref.dtype)


def encode(x, prep):
    """x: (B, T, F) float32 -> (B, T', H).  Whole encode path = ONE pallas_call."""
    b, t_in, f_in = x.shape
    assert t_in * f_in == prep["in_feat"], "prep was built for a different (T, F)"
    x2 = x.reshape(b, t_in * f_in).astype(jnp.float32)        # free row-major flatten
    if prep["in_cols"] != t_in * f_in:
        x2 = jnp.pad(x2, ((0, 0), (0, prep["in_cols"] - t_in * f_in)))

    wbuf = prep["wbuf"]
    t_out, hdim = prep["t_out"], prep["hdim"]
    kernel = partial(_encode_kernel, dims=prep["dims"])

    out = pl.pallas_call(
        kernel,
        out_shape=jax.ShapeDtypeStruct((b, t_out * hdim), jnp.float32),
        grid=(1,),
        in_specs=[pl.BlockSpec(x2.shape, lambda i: (0, 0)),
                  pl.BlockSpec(wbuf.shape, lambda i: (0, 0))],
        out_specs=pl.BlockSpec((b, t_out * hdim), lambda i: (0, 0)),
        compiler_params=pltpu.CompilerParams(dimension_semantics=("arbitrary",)),
    )(x2, wbuf)
    return out.reshape(b, t_out, hdim)


# ----------------------------------------------------------------------------
# Model config / params (matches the PyTorch module)
# ----------------------------------------------------------------------------
CONFIG = {
    "dropout": 0.0,   # eval mode / p=0 -> dropout is identity
    "encoder": {
        "conv": [  # (out_c, kernel_h, kernel_w, stride)
            (4, 3, 3, 2),
            (8, 3, 3, 2),
        ],
        "rnn": {"dim": 32, "layers": 1, "bidirectional": False},
    },
}


def conv_out_size(n, conv_cfg, dim):
    for out_c, h, w, s in conv_cfg:
        k = (h, w)[dim]
        n = int(math.ceil((n - k + 1) / s))
    return n


def init_params(key, input_dim, config):
    conv_cfg = config["encoder"]["conv"]
    rnn_cfg = config["encoder"]["rnn"]
    params = {"conv": [], "rnn": []}
    in_c = 1
    for out_c, kh, kw, s in conv_cfg:
        key, k1, k2 = jax.random.split(key, 3)
        bound = 1.0 / math.sqrt(in_c * kh * kw)
        w = jax.random.uniform(k1, (kh, kw, in_c, out_c), jnp.float32, -bound, bound)
        b = jax.random.uniform(k2, (out_c,), jnp.float32, -bound, bound)
        params["conv"].append((w, b, s))
        in_c = out_c

    conv_out = in_c * conv_out_size(input_dim, conv_cfg, 1)
    assert conv_out > 0, "Convolutional output frequency dimension is negative."

    H = rnn_cfg["dim"]
    d_in = conv_out
    for _ in range(rnn_cfg["layers"]):
        key, k1, k2, k3, k4 = jax.random.split(key, 5)
        bound = 1.0 / math.sqrt(H)
        w_ih = jax.random.uniform(k1, (3 * H, d_in), jnp.float32, -bound, bound)
        w_hh = jax.random.uniform(k2, (3 * H, H), jnp.float32, -bound, bound)
        b_ih = jax.random.uniform(k3, (3 * H,), jnp.float32, -bound, bound)
        b_hh = jax.random.uniform(k4, (3 * H,), jnp.float32, -bound, bound)
        params["rnn"].append((w_ih, b_ih, w_hh, b_hh))
        d_in = H
    return params


# ----------------------------------------------------------------------------
# Pure-JAX reference (correctness check only)
# ----------------------------------------------------------------------------
def encode_ref(x, params):
    h = x[..., None]
    for w, b, s in params["conv"]:
        y = jax.lax.conv_general_dilated(
            h, w, window_strides=(s, s), padding="VALID",
            dimension_numbers=("NHWC", "HWIO", "NHWC"))
        h = jnp.maximum(y + b, 0.0)
    B, Tp, Fp, C = h.shape
    h = jnp.transpose(h, (0, 1, 3, 2)).reshape(B, Tp, C * Fp)

    for (w_ih, b_ih, w_hh, b_hh) in params["rnn"]:
        H = w_hh.shape[1]

        def step(hprev, xt):
            gx = xt @ w_ih.T + b_ih
            gh = hprev @ w_hh.T + b_hh
            r = jax.nn.sigmoid(gx[:, :H] + gh[:, :H])
            z = jax.nn.sigmoid(gx[:, H:2 * H] + gh[:, H:2 * H])
            n = jnp.tanh(gx[:, 2 * H:] + r * gh[:, 2 * H:])
            hn = (1 - z) * n + z * hprev
            return hn, hn

        h0 = jnp.zeros((h.shape[0], H), jnp.float32)
        _, ys = jax.lax.scan(step, h0, jnp.transpose(h, (1, 0, 2)))
        h = jnp.transpose(ys, (1, 0, 2))
    return h


# ----------------------------------------------------------------------------
if __name__ == "__main__":
    B, T, F = 2, 16, 16            # input_dim = F = 16
    key = jax.random.PRNGKey(0)
    x = jax.random.normal(key, (B, T, F), dtype=jnp.float32)

    params = init_params(jax.random.PRNGKey(42), input_dim=F, config=CONFIG)
    prep = prepare_encode_params(params, T, F)     # one-time weight packing

    out = jax.block_until_ready(encode(x, prep))

    ref = jax.block_until_ready(encode_ref(x, params))
    assert out.shape == ref.shape == (B, 3, CONFIG["encoder"]["rnn"]["dim"]), out.shape
    err = float(jnp.max(jnp.abs(out - ref)))
    assert err < 5e-4, err

    print("KERNEL_OK")
</pallas_src>

<mosaic_0001>
module attributes {stable_mosaic.version = 11 : i64} {
  func.func @_encode_kernel(%arg0: i32, %arg1: memref<2x256xf32, #tpu.memory_space<vmem>>, %arg2: memref<704x384xf32, #tpu.memory_space<vmem>>, %arg3: memref<2x96xf32, #tpu.memory_space<vmem>>) attributes {dimension_semantics = [#tpu.dimension_semantics<arbitrary>], iteration_bounds = array<i64: 1>, scalar_prefetch = 0 : i64, scratch_operands = 0 : i64, tpu.core_type = #tpu.core_type<tc>, window_params = [{pipeline_mode = #tpu.pipeline_mode<synchronous>, transform_indices = @transform_0, window_bounds = array<i64: 2, 256>}, {pipeline_mode = #tpu.pipeline_mode<synchronous>, transform_indices = @transform_1, window_bounds = array<i64: 704, 384>}, {pipeline_mode = #tpu.pipeline_mode<synchronous>, transform_indices = @transform_2, window_bounds = array<i64: 2, 96>}]} {
    %c0 = arith.constant 0 : index
    %c0_0 = arith.constant 0 : index
    %0 = vector.load %arg1[%c0, %c0_0] : memref<2x256xf32, #tpu.memory_space<vmem>>, vector<2x256xf32>
    %c0_1 = arith.constant 0 : index
    %c0_2 = arith.constant 0 : index
    %1 = vector.load %arg2[%c0_1, %c0_2] : memref<704x384xf32, #tpu.memory_space<vmem>>, vector<256x256xf32>
    %c256 = arith.constant 256 : index
    %c0_3 = arith.constant 0 : index
    %2 = vector.load %arg2[%c256, %c0_3] : memref<704x384xf32, #tpu.memory_space<vmem>>, vector<1x256xf32>
    %cst = arith.constant dense<0.000000e+00> : vector<2x256xf32>
    %3 = tpu.matmul %0, %1, %cst {dimension_numbers = #tpu.dot_dimension_numbers<[1], [0], [0], [1], [0, 0, 1, 1], [], []>} : vector<2x256xf32>, vector<256x256xf32>, vector<2x256xf32> -> vector<2x256xf32>
    %4 = vector.broadcast %2 : vector<1x256xf32> to vector<2x256xf32>
    %5 = arith.addf %3, %4 : vector<2x256xf32>
    %cst_4 = arith.constant 0.000000e+00 : f32
    %6 = vector.broadcast %cst_4 : f32 to vector<2x256xf32>
    %7 = arith.maximumf %5, %6 : vector<2x256xf32>
    %c264 = arith.constant 264 : index
    %c0_5 = arith.constant 0 : index
    %8 = vector.load %arg2[%c264, %c0_5] : memref<704x384xf32, #tpu.memory_space<vmem>>, vector<256x128xf32>
    %c520 = arith.constant 520 : index
    %c0_6 = arith.constant 0 : index
    %9 = vector.load %arg2[%c520, %c0_6] : memref<704x384xf32, #tpu.memory_space<vmem>>, vector<1x128xf32>
    %cst_7 = arith.constant dense<0.000000e+00> : vector<2x128xf32>
    %10 = tpu.matmul %7, %8, %cst_7 {dimension_numbers = #tpu.dot_dimension_numbers<[1], [0], [0], [1], [0, 0, 1, 1], [], []>} : vector<2x256xf32>, vector<256x128xf32>, vector<2x128xf32> -> vector<2x128xf32>
    %11 = vector.broadcast %9 : vector<1x128xf32> to vector<2x128xf32>
    %12 = arith.addf %10, %11 : vector<2x128xf32>
    %cst_8 = arith.constant 0.000000e+00 : f32
    %13 = vector.broadcast %cst_8 : f32 to vector<2x128xf32>
    %14 = arith.maximumf %12, %13 : vector<2x128xf32>
    %c528 = arith.constant 528 : index
    %c0_9 = arith.constant 0 : index
    %15 = vector.load %arg2[%c528, %c0_9] : memref<704x384xf32, #tpu.memory_space<vmem>>, vector<128x384xf32>
    %c656 = arith.constant 656 : index
    %c0_10 = arith.constant 0 : index
    %16 = vector.load %arg2[%c656, %c0_10] : memref<704x384xf32, #tpu.memory_space<vmem>>, vector<1x384xf32>
    %cst_11 = arith.constant dense<0.000000e+00> : vector<2x384xf32>
    %17 = tpu.matmul %14, %15, %cst_11 {dimension_numbers = #tpu.dot_dimension_numbers<[1], [0], [0], [1], [0, 0, 1, 1], [], []>} : vector<2x128xf32>, vector<128x384xf32>, vector<2x384xf32> -> vector<2x384xf32>
    %18 = vector.broadcast %16 : vector<1x384xf32> to vector<2x384xf32>
    %19 = arith.addf %17, %18 : vector<2x384xf32>
    %c664 = arith.constant 664 : index
    %c0_12 = arith.constant 0 : index
    %20 = vector.load %arg2[%c664, %c0_12] : memref<704x384xf32, #tpu.memory_space<vmem>>, vector<32x128xf32>
    %c696 = arith.constant 696 : index
    %c0_13 = arith.constant 0 : index
    %21 = vector.load %arg2[%c696, %c0_13] : memref<704x384xf32, #tpu.memory_space<vmem>>, vector<1x128xf32>
    %22 = vector.shape_cast %21 : vector<1x128xf32> to vector<1x128xf32>
    %23 = vector.broadcast %22 : vector<1x128xf32> to vector<2x128xf32>
    %cst_14 = arith.constant 0.000000e+00 : f32
    %24 = vector.broadcast %cst_14 : f32 to vector<2x32xf32>
    %cst_15 = arith.constant dense<0.000000e+00> : vector<2x128xf32>
    %25 = tpu.matmul %24, %20, %cst_15 {dimension_numbers = #tpu.dot_dimension_numbers<[1], [0], [0], [1], [0, 0, 1, 1], [], []>} : vector<2x32xf32>, vector<32x128xf32>, vector<2x128xf32> -> vector<2x128xf32>
    %26 = arith.addf %25, %23 : vector<2x128xf32>
    %27 = vector.extract_strided_slice %19 {offsets = [0, 0], sizes = [2, 128], strides = [1, 1]} : vector<2x384xf32> to vector<2x128xf32>
    %28 = arith.addf %27, %26 : vector<2x128xf32>
    %29 = vector.extract_strided_slice %28 {offsets = [0, 0], sizes = [2, 32], strides = [1, 1]} : vector<2x128xf32> to vector<2x32xf32>
    %30 = arith.negf %29 : vector<2x32xf32>
    %31 = math.exp %30 : vector<2x32xf32>
    %cst_16 = arith.constant 1.000000e+00 : f32
    %32 = vector.broadcast %cst_16 : f32 to vector<2x32xf32>
    %33 = arith.addf %32, %31 : vector<2x32xf32>
    %34 = arith.divf %32, %33 : vector<2x32xf32>
    %35 = vector.extract_strided_slice %28 {offsets = [0, 32], sizes = [2, 32], strides = [1, 1]} : vector<2x128xf32> to vector<2x32xf32>
    %36 = arith.negf %35 : vector<2x32xf32>
    %37 = math.exp %36 : vector<2x32xf32>
    %cst_17 = arith.constant 1.000000e+00 : f32
    %38 = vector.broadcast %cst_17 : f32 to vector<2x32xf32>
    %39 = arith.addf %38, %37 : vector<2x32xf32>
    %40 = arith.divf %38, %39 : vector<2x32xf32>
    %41 = vector.extract_strided_slice %27 {offsets = [0, 64], sizes = [2, 32], strides = [1, 1]} : vector<2x128xf32> to vector<2x32xf32>
    %42 = vector.extract_strided_slice %26 {offsets = [0, 64], sizes = [2, 32], strides = [1, 1]} : vector<2x128xf32> to vector<2x32xf32>
    %43 = arith.mulf %34, %42 : vector<2x32xf32>
    %44 = arith.addf %41, %43 : vector<2x32xf32>
    %45 = math.tanh %44 : vector<2x32xf32>
    %cst_18 = arith.constant 1.000000e+00 : f32
    %46 = vector.broadcast %cst_18 : f32 to vector<2x32xf32>
    %47 = arith.subf %46, %40 : vector<2x32xf32>
    %48 = arith.mulf %47, %45 : vector<2x32xf32>
    %49 = arith.mulf %40, %24 : vector<2x32xf32>
    %50 = arith.addf %48, %49 : vector<2x32xf32>
    %cst_19 = arith.constant dense<0.000000e+00> : vector<2x128xf32>
    %51 = tpu.matmul %50, %20, %cst_19 {dimension_numbers = #tpu.dot_dimension_numbers<[1], [0], [0], [1], [0, 0, 1, 1], [], []>} : vector<2x32xf32>, vector<32x128xf32>, vector<2x128xf32> -> vector<2x128xf32>
    %52 = arith.addf %51, %23 : vector<2x128xf32>
    %53 = vector.extract_strided_slice %19 {offsets = [0, 128], sizes = [2, 128], strides = [1, 1]} : vector<2x384xf32> to vector<2x128xf32>
    %54 = arith.addf %53, %52 : vector<2x128xf32>
    %55 = vector.extract_strided_slice %54 {offsets = [0, 0], sizes = [2, 32], strides = [1, 1]} : vector<2x128xf32> to vector<2x32xf32>
    %56 = arith.negf %55 : vector<2x32xf32>
    %57 = math.exp %56 : vector<2x32xf32>
    %cst_20 = arith.constant 1.000000e+00 : f32
    %58 = vector.broadcast %cst_20 : f32 to vector<2x32xf32>
    %59 = arith.addf %58, %57 : vector<2x32xf32>
    %60 = arith.divf %58, %59 : vector<2x32xf32>
    %61 = vector.extract_strided_slice %54 {offsets = [0, 32], sizes = [2, 32], strides = [1, 1]} : vector<2x128xf32> to vector<2x32xf32>
    %62 = arith.negf %61 : vector<2x32xf32>
    %63 = math.exp %62 : vector<2x32xf32>
    %cst_21 = arith.constant 1.000000e+00 : f32
    %64 = vector.broadcast %cst_21 : f32 to vector<2x32xf32>
    %65 = arith.addf %64, %63 : vector<2x32xf32>
    %66 = arith.divf %64, %65 : vector<2x32xf32>
    %67 = vector.extract_strided_slice %53 {offsets = [0, 64], sizes = [2, 32], strides = [1, 1]} : vector<2x128xf32> to vector<2x32xf32>
    %68 = vector.extract_strided_slice %52 {offsets = [0, 64], sizes = [2, 32], strides = [1, 1]} : vector<2x128xf32> to vector<2x32xf32>
    %69 = arith.mulf %60, %68 : vector<2x32xf32>
    %70 = arith.addf %67, %69 : vector<2x32xf32>
    %71 = math.tanh %70 : vector<2x32xf32>
    %cst_22 = arith.constant 1.000000e+00 : f32
    %72 = vector.broadcast %cst_22 : f32 to vector<2x32xf32>
    %73 = arith.subf %72, %66 : vector<2x32xf32>
    %74 = arith.mulf %73, %71 : vector<2x32xf32>
    %75 = arith.mulf %66, %50 : vector<2x32xf32>
    %76 = arith.addf %74, %75 : vector<2x32xf32>
    %cst_23 = arith.constant dense<0.000000e+00> : vector<2x128xf32>
    %77 = tpu.matmul %76, %20, %cst_23 {dimension_numbers = #tpu.dot_dimension_numbers<[1], [0], [0], [1], [0, 0, 1, 1], [], []>} : vector<2x32xf32>, vector<32x128xf32>, vector<2x128xf32> -> vector<2x128xf32>
    %78 = arith.addf %77, %23 : vector<2x128xf32>
    %79 = vector.extract_strided_slice %19 {offsets = [0, 256], sizes = [2, 128], strides = [1, 1]} : vector<2x384xf32> to vector<2x128xf32>
    %80 = arith.addf %79, %78 : vector<2x128xf32>
    %81 = vector.extract_strided_slice %80 {offsets = [0, 0], sizes = [2, 32], strides = [1, 1]} : vector<2x128xf32> to vector<2x32xf32>
    %82 = arith.negf %81 : vector<2x32xf32>
    %83 = math.exp %82 : vector<2x32xf32>
    %cst_24 = arith.constant 1.000000e+00 : f32
    %84 = vector.broadcast %cst_24 : f32 to vector<2x32xf32>
    %85 = arith.addf %84, %83 : vector<2x32xf32>
    %86 = arith.divf %84, %85 : vector<2x32xf32>
    %87 = vector.extract_strided_slice %80 {offsets = [0, 32], sizes = [2, 32], strides = [1, 1]} : vector<2x128xf32> to vector<2x32xf32>
    %88 = arith.negf %87 : vector<2x32xf32>
    %89 = math.exp %88 : vector<2x32xf32>
    %cst_25 = arith.constant 1.000000e+00 : f32
    %90 = vector.broadcast %cst_25 : f32 to vector<2x32xf32>
    %91 = arith.addf %90, %89 : vector<2x32xf32>
    %92 = arith.divf %90, %91 : vector<2x32xf32>
    %93 = vector.extract_strided_slice %79 {offsets = [0, 64], sizes = [2, 32], strides = [1, 1]} : vector<2x128xf32> to vector<2x32xf32>
    %94 = vector.extract_strided_slice %78 {offsets = [0, 64], sizes = [2, 32], strides = [1, 1]} : vector<2x128xf32> to vector<2x32xf32>
    %95 = arith.mulf %86, %94 : vector<2x32xf32>
    %96 = arith.addf %93, %95 : vector<2x32xf32>
    %97 = math.tanh %96 : vector<2x32xf32>
    %cst_26 = arith.constant 1.000000e+00 : f32
    %98 = vector.broadcast %cst_26 : f32 to vector<2x32xf32>
    %99 = arith.subf %98, %92 : vector<2x32xf32>
    %100 = arith.mulf %99, %97 : vector<2x32xf32>
    %101 = arith.mulf %92, %76 : vector<2x32xf32>
    %102 = arith.addf %100, %101 : vector<2x32xf32>
    %103 = tpu.concatenate %50, %76, %102 in 1 : vector<2x32xf32>, vector<2x32xf32>, vector<2x32xf32> -> vector<2x96xf32>
    %c0_27 = arith.constant 0 : index
    %c0_28 = arith.constant 0 : index
    %104 = vector.load %arg3[%c0_27, %c0_28] : memref<2x96xf32, #tpu.memory_space<vmem>>, vector<2x96xf32>
    tpu.vector_store %arg3[%c0_27, %c0_28], %103 {strides = array<i32>} : memref<2x96xf32, #tpu.memory_space<vmem>>, vector<2x96xf32>,
    return
  }
  func.func @transform_0(%arg0: i32) -> (i32, i32) {
    %c0_i32 = arith.constant 0 : i32
    %c0_i32_0 = arith.constant 0 : i32
    %c0_i32_1 = arith.constant 0 : i32
    return %c0_i32, %c0_i32_0 : i32, i32
  }
  func.func @transform_1(%arg0: i32) -> (i32, i32) {
    %c0_i32 = arith.constant 0 : i32
    %c0_i32_0 = arith.constant 0 : i32
    %c0_i32_1 = arith.constant 0 : i32
    return %c0_i32, %c0_i32_0 : i32, i32
  }
  func.func @transform_2(%arg0: i32) -> (i32, i32) {
    %c0_i32 = arith.constant 0 : i32
    %c0_i32_0 = arith.constant 0 : i32
    %c0_i32_1 = arith.constant 0 : i32
    return %c0_i32, %c0_i32_0 : i32, i32
  }
}

</mosaic_0001>

<bundles_post_ra>
// kernel: tpu_custom_call.1
= control target key start
LH: loop header
LB: loop body
LE: loop exit
PB: predicated region body
PF: predicated region fallthrough
CT: control target
= control target key end

     0   :  { %7 = vsyncpa [#allocation3], 0  ;;  %s1398_s0 = inlined_call_operand.hbm [shape: f32[2,256], index: 0, kind: input, shape index: {}]   ;;  %s1399_s1 = inlined_call_operand.hbm [shape: f32[704,384], index: 1, kind: input, shape index: {}]   ;;  %s1400_s2 = inlined_call_operand.hbm [shape: f32[2,96], index: 2, kind: output, shape index: {}]  }
   0x1   :  { %8 = vsyncpa [#allocation6], 0 }
   0x2   :  { %9 = vsyncpa [#allocation4], 0  ;;  %s1256_s9 = smov [#allocation2]   ;;  %s1257_s11 = smov [#allocation5]  }
   0x3   :  { %s16_s10 = sshll.u32 %s1256_s9, 4  ;;  %s25_s12 = sshll.u32 %s1257_s11, 4  ;;  %s17_s10 = int_to_ptr.vmem [resolvable:$true] %s16_s10  ;;  %s1282_s12 = int_to_ptr.vmem [resolvable:$true] %s25_s12 }
   0x4   :  { %s1184_s15 = scalar_lea.hbm %s1398_s0, 64 }
   0x5   :  { %p1185_p0 = scmp.ne.s32.totalorder %s1398_s0, %s1184_s15  ;;  %p1188_p1 = scmp.lt.u32.totalorder %s1184_s15, %s1398_s0 }
   0x7   :  { %p1190_p2 = pnand %p1188_p1, %p1185_p0 }
   0x9   :  { %1193 = shalt.err (!%p1190_p2)
}
   0xa   :  { %s1194_s20 = scalar_lea.vmem %s17_s10, 64  ;;  %p1199_p4 = scmp.lt.s32.totalorder %s17_s10, %s17_s10 }
   0xb   :  { %p1195_p3 = scmp.ne.s32.totalorder %s17_s10, %s1194_s20  ;;  %p1200_p5 = scmp.lt.s32.totalorder %s1194_s20, %s1194_s20 }
   0xd   :  { %p1201_p6 = por %p1200_p5, %p1199_p4 }
   0xf   :  { %p1202_p7 = pnand %p1201_p6, %p1195_p3 }
  0x11   :  { %1205 = shalt.err (!%p1202_p7)
}
  0x12   :  { %19 = dma.hbm_to_vmem [thread:$0]  %s1398_s0, 64, %s17_s10, [#allocation3]  }
  0x13   :  { %s1206_s25 = scalar_lea.hbm %s1399_s1, 33792 }
  0x14   :  { %p1207_p8 = scmp.ne.s32.totalorder %s1399_s1, %s1206_s25  ;;  %p1210_p9 = scmp.lt.u32.totalorder %s1206_s25, %s1399_s1 }
  0x16   :  { %p1212_p10 = pnand %p1210_p9, %p1207_p8 }
  0x18   :  { %1215 = shalt.err (!%p1212_p10)
}
  0x19   :  { %s1216_s30 = scalar_lea.vmem %s1282_s12, 33792  ;;  %p1221_p12 = scmp.lt.s32.totalorder %s1282_s12, %s1282_s12 }
  0x1a   :  { %p1217_p11 = scmp.ne.s32.totalorder %s1282_s12, %s1216_s30  ;;  %p1222_p13 = scmp.lt.s32.totalorder %s1216_s30, %s1216_s30 }
  0x1c   :  { %p1223_p0 = por %p1222_p13, %p1221_p12 }
  0x1e   :  { %p1224_p1 = pnand %p1223_p0, %p1217_p11 }
  0x20   :  { %1227 = shalt.err (!%p1224_p1)
}
  0x21   :  { %s1258_s0 = smov 384   ;;  %s1259_s3 = smov 24  }
  0x22   :  { %31 = dma.hbm_to_vmem [thread:$0]  %s1399_s1, 33792, %s1282_s12, [#allocation6], %s1258_s0, %s1258_s0, %s1259_s3  }
  0x23   :  { %1250 = dma.done.wait [#allocation3], 64  }
  0x24   :  { %1251 = vsyncadd [#allocation3], 4294967232 }
  0x25   :  { %1252 = dma.done.wait [#allocation6], 33792  }
  0x26   :  { %1253 = vsyncadd [#allocation6], 4294933504  ;;  %v40_v0 = vld [vmem:[#allocation5 + $0x8] sm:$0xff]  ;;  %v42_v1 = vld [vmem:[#allocation5 + $0x20] sm:$0xff]  ;;  %vm1262_vm0 = vmmov 0   ;;  %s1263_s1 = smov 64  }
  0x27   :  { %v39_v2 = vld [vmem:[#allocation5] sm:$0xff]  ;;  %v985_v3 = vpack.c.bf16 %v42_v1, %v40_v0  ;;  %v41_v4 = vld [vmem:[#allocation5 + $0x18] sm:$0xff]  ;;  %v46_v6 = vld [vmem:[#allocation5 + $0x50] sm:$0xff]  ;;  %s1264_s6 = smov 96   ;;  %vm516_vm1 = vcmask 261120   ;;  %s1265_s7 = smov 32  }
  0x28   :  { %v44_v5 = vld [vmem:[#allocation5 + $0x38] sm:$0xff]  ;;  %v987_v7 = vpack.c.bf16 %v41_v4, %v39_v2  ;;  %v43_v9 = vld [vmem:[#allocation5 + $0x30] sm:$0xff]  ;;  %v45_v10 = vld [vmem:[#allocation5 + $0x48] sm:$0xff]  ;;  %s1266_s8 = smov [#allocation7]   ;;  %vm824_vm2 = vcmask 523264   ;;  %vm826_vm3 = vcmask 779264  }
  0x29   :  { %v989_v8 = vpack.c.bf16 %v46_v6, %v44_v5  ;;  %v48_v11 = vld [vmem:[#allocation5 + $0x68] sm:$0xff]  ;;  %986 = vmatprep.subr.bf16.mxu0 %v985_v3  ;;  %v50_v12 = vld [vmem:[#allocation5 + $0x80] sm:$0xff]  ;;  %v991_v13 = vpack.c.bf16 %v45_v10, %v43_v9  ;;  %v49_v16 = vld [vmem:[#allocation5 + $0x78] sm:$0xff]  ;;  %s834_s9 = sshll.u32 %s1266_s8, 4  ;;  %s835_s9 = int_to_ptr.vmem [resolvable:$true] %s834_s9 }
  0x2a   :  { %988 = vmatpush1.bf16.msra.mxu0 %v987_v7  ;;  %v993_v14 = vpack.c.bf16 %v50_v12, %v48_v11  ;;  %v47_v15 = vld [vmem:[#allocation5 + $0x60] sm:$0xff]  ;;  %v52_v17 = vld [vmem:[#allocation5 + $0x98] sm:$0xff]  ;;  %v54_v18 = vld [vmem:[#allocation5 + $0xb0] sm:$0xff]  ;;  %s1228_s10 = scalar_lea.vmem %s835_s9, 32  ;;  %p1233_p3 = scmp.lt.s32.totalorder %s835_s9, %s835_s9 }
  0x2b   :  { %990 = vmatprep.subr.bf16.mxu0 %v989_v8  ;;  %v995_v19 = vpack.c.bf16 %v49_v16, %v47_v15  ;;  %v997_v20 = vpack.c.bf16 %v54_v18, %v52_v17  ;;  %v51_v21 = vld [vmem:[#allocation5 + $0x90] sm:$0xff]  ;;  %v53_v22 = vld [vmem:[#allocation5 + $0xa8] sm:$0xff]  ;;  %v58_v24 = vld [vmem:[#allocation5 + $0xe0] sm:$0xff]  ;;  %p1229_p2 = scmp.ne.s32.totalorder %s835_s9, %s1228_s10  ;;  %p1234_p4 = scmp.lt.s32.totalorder %s1228_s10, %s1228_s10 }
  0x2c   :  { %v56_v23 = vld [vmem:[#allocation5 + $0xc8] sm:$0xff]  ;;  %v999_v25 = vpack.c.bf16 %v53_v22, %v51_v21  ;;  %v55_v27 = vld [vmem:[#allocation5 + $0xc0] sm:$0xff]  ;;  %v57_v28 = vld [vmem:[#allocation5 + $0xd8] sm:$0xff] }
  0x2d   :  { %v1001_v26 = vpack.c.bf16 %v58_v24, %v56_v23  ;;  %v60_v29 = vld [vmem:[#allocation5 + $0xf8] sm:$0xff]  ;;  %v62_v30 = vld [vmem:[#allocation5 + $0x110] sm:$0xff]  ;;  %v1003_v31 = vpack.c.bf16 %v57_v28, %v55_v27  ;;  %v61_v34 = vld [vmem:[#allocation5 + $0x108] sm:$0xff]  ;;  %p1235_p5 = por %p1234_p4, %p1233_p3 }
  0x2e   :  { %992 = vmatpush1.bf16.msra.mxu0 %v991_v13  ;;  %v1005_v32 = vpack.c.bf16 %v62_v30, %v60_v29  ;;  %v59_v33 = vld [vmem:[#allocation5 + $0xf0] sm:$0xff]  ;;  %v64_v35 = vld [vmem:[#allocation5 + $0x128] sm:$0xff]  ;;  %v66_v36 = vld [vmem:[#allocation5 + $0x140] sm:$0xff] }
  0x2f   :  { %994 = vmatprep.subr.bf16.mxu0 %v993_v14  ;;  %v1007_v37 = vpack.c.bf16 %v61_v34, %v59_v33  ;;  %v63_v38 = vld [vmem:[#allocation5 + $0x120] sm:$0xff]  ;;  %v65_v39 = vld [vmem:[#allocation5 + $0x138] sm:$0xff]  ;;  %v1009_v41 = vpack.c.bf16 %v66_v36, %v64_v35  ;;  %v70_v42 = vld [vmem:[#allocation5 + $0x170] sm:$0xff]  ;;  %p1236_p6 = pnand %p1235_p5, %p1229_p2 }
  0x30   :  { %v68_v40 = vld [vmem:[#allocation5 + $0x158] sm:$0xff]  ;;  %v217_v46 = vld [vmem:[#allocation5 + $0x4b0] sm:$0xff]  ;;  %v218_v51 = vld [vmem:[#allocation5 + $0x4c8] sm:$0xff]  ;;  %v1011_v54 = vpack.c.bf16 %v65_v39, %v63_v38 }
  0x31   :  { %v1313_v43 = vld.sshfl [vmem:[#allocation2] sm:$0x33 pattern:$0x76325410]  ;;  %v201_v48 = vld [vmem:[#allocation5 + $0x330] sm:$0xff]  ;;  %v219_v52 = vld [vmem:[#allocation5 + $0x4e0] sm:$0xff]  ;;  %v1013_v59 = vpack.c.bf16 %v70_v42, %v68_v40 }
  0x32   :  { %996 = vmatpush1.bf16.msra.mxu0 %v995_v19  ;;  %v216_v44 = vld [vmem:[#allocation5 + $0x498] sm:$0xff]  ;;  %v124_v45 = vcombine.high %v1313_v43, %v1313_v43  ;;  %v202_v53 = vld [vmem:[#allocation5 + $0x348] sm:$0xff]  ;;  %v1053_v55 = vpack.c.bf16 %v219_v52, %v218_v51  ;;  %v203_v56 = vld [vmem:[#allocation5 + $0x360] sm:$0xff] }
  0x33   :  { %998 = vmatprep.subr.bf16.mxu0 %v997_v20  ;;  %v200_v47 = vld [vmem:[#allocation5 + $0x318] sm:$0xff]  ;;  %v1049_v49 = vpack.c.bf16 %v217_v46, %v216_v44  ;;  %v221_v58 = vld [vmem:[#allocation5 + $0x510] sm:$0xff]  ;;  %v69_v61 = vld [vmem:[#allocation5 + $0x168] sm:$0xff]  ;;  %v1055_v0 = vpack.c.bf16 %v203_v56, %v202_v53 }
  0x34   :  { %v1051_v50 = vpack.c.bf16 %v201_v48, %v200_v47  ;;  %191 = vmatprep.mubr.f32.mxu0 %v124_v45  ;;  %v220_v57 = vld [vmem:[#allocation5 + $0x4f8] sm:$0xff]  ;;  %v67_v60 = vld [vmem:[#allocation5 + $0x150] sm:$0xff]  ;;  %v72_v62 = vld [vmem:[#allocation5 + $0x188] sm:$0xff] }
  0x35   :  { %1050 = vmatprep.subr.bf16.mxu1 %v1049_v49  ;;  %v74_v63 = vld [vmem:[#allocation5 + $0x1a0] sm:$0xff]  ;;  %v1057_v1 = vpack.c.bf16 %v221_v58, %v220_v57  ;;  %v204_v2 = vld [vmem:[#allocation5 + $0x378] sm:$0xff]  ;;  %v205_v3 = vld [vmem:[#allocation5 + $0x390] sm:$0xff]  ;;  %v1015_v4 = vpack.c.bf16 %v69_v61, %v67_v60 }
  0x36   :  { %1000 = vmatpush1.bf16.msra.mxu0 %v999_v25  ;;  %1052 = vmatpush3.bf16.msra.mxu1 %v1051_v50  ;;  %v222_v5 = vld [vmem:[#allocation5 + $0x528] sm:$0xff]  ;;  %v223_v6 = vld [vmem:[#allocation5 + $0x540] sm:$0xff]  ;;  %v1017_v7 = vpack.c.bf16 %v74_v63, %v72_v62  ;;  %v73_v9 = vld [vmem:[#allocation5 + $0x198] sm:$0xff]  ;;  %v1059_v12 = vpack.c.bf16 %v205_v3, %v204_v2 }
  0x37   :  { %1002 = vmatprep.subr.bf16.mxu0 %v1001_v26  ;;  %1054 = vmatprep.subr.bf16.mxu1 %v1053_v55  ;;  %v71_v8 = vld [vmem:[#allocation5 + $0x180] sm:$0xff]  ;;  %v76_v10 = vld [vmem:[#allocation5 + $0x1b8] sm:$0xff]  ;;  %v78_v11 = vld [vmem:[#allocation5 + $0x1d0] sm:$0xff]  ;;  %v1061_v13 = vpack.c.bf16 %v223_v6, %v222_v5 }
  0x38   :  { %v206_v14 = vld [vmem:[#allocation5 + $0x3a8] sm:$0xff]  ;;  %v207_v15 = vld [vmem:[#allocation5 + $0x3c0] sm:$0xff]  ;;  %v1019_v16 = vpack.c.bf16 %v73_v9, %v71_v8  ;;  %v224_v17 = vld [vmem:[#allocation5 + $0x558] sm:$0xff]  ;;  %v1021_v19 = vpack.c.bf16 %v78_v11, %v76_v10 }
  0x39   :  { %v225_v18 = vld [vmem:[#allocation5 + $0x570] sm:$0xff]  ;;  %v77_v21 = vld [vmem:[#allocation5 + $0x1c8] sm:$0xff]  ;;  %v82_v23 = vld [vmem:[#allocation5 + $0x200] sm:$0xff]  ;;  %v1063_v24 = vpack.c.bf16 %v207_v15, %v206_v14 }
  0x3a   :  { %1004 = vmatpush1.bf16.msra.mxu0 %v1003_v31  ;;  %1056 = vmatpush3.bf16.msra.mxu1 %v1055_v0  ;;  %v75_v20 = vld [vmem:[#allocation5 + $0x1b0] sm:$0xff]  ;;  %v80_v22 = vld [vmem:[#allocation5 + $0x1e8] sm:$0xff]  ;;  %v1065_v25 = vpack.c.bf16 %v225_v18, %v224_v17  ;;  %v208_v26 = vld [vmem:[#allocation5 + $0x3d8] sm:$0xff] }
  0x3b   :  { %1006 = vmatprep.subr.bf16.mxu0 %v1005_v32  ;;  %1058 = vmatprep.subr.bf16.mxu1 %v1057_v1  ;;  %v209_v27 = vld [vmem:[#allocation5 + $0x3f0] sm:$0xff]  ;;  %v1023_v28 = vpack.c.bf16 %v77_v21, %v75_v20  ;;  %v226_v29 = vld [vmem:[#allocation5 + $0x588] sm:$0xff]  ;;  %v227_v30 = vld [vmem:[#allocation5 + $0x5a0] sm:$0xff]  ;;  %v1025_v31 = vpack.c.bf16 %v82_v23, %v80_v22 }
  0x3c   :  { %v79_v32 = vld [vmem:[#allocation5 + $0x1e0] sm:$0xff]  ;;  %v81_v33 = vld [vmem:[#allocation5 + $0x1f8] sm:$0xff]  ;;  %v86_v35 = vld [vmem:[#allocation5 + $0x230] sm:$0xff]  ;;  %v1067_v36 = vpack.c.bf16 %v209_v27, %v208_v26 }
  0x3d   :  { %v84_v34 = vld [vmem:[#allocation5 + $0x218] sm:$0xff]  ;;  %v210_v38 = vld [vmem:[#allocation5 + $0x408] sm:$0xff]  ;;  %v211_v39 = vld [vmem:[#allocation5 + $0x420] sm:$0xff]  ;;  %v1027_v40 = vpack.c.bf16 %v81_v33, %v79_v32 }
  0x3e   :  { %1008 = vmatpush1.bf16.msra.mxu0 %v1007_v37  ;;  %1060 = vmatpush3.bf16.msra.mxu1 %v1059_v12  ;;  %v1069_v37 = vpack.c.bf16 %v227_v30, %v226_v29  ;;  %v229_v42 = vld [vmem:[#allocation5 + $0x5d0] sm:$0xff]  ;;  %v1029_v44 = vpack.c.bf16 %v86_v35, %v84_v34  ;;  %v85_v46 = vld [vmem:[#allocation5 + $0x228] sm:$0xff]  ;;  %v90_v48 = vld [vmem:[#allocation5 + $0x260] sm:$0xff]  ;;  %v1071_v49 = vpack.c.bf16 %v211_v39, %v210_v38 }
  0x3f   :  { %1010 = vmatprep.subr.bf16.mxu0 %v1009_v41  ;;  %1062 = vmatprep.subr.bf16.mxu1 %v1061_v13  ;;  %v228_v41 = vld [vmem:[#allocation5 + $0x5b8] sm:$0xff]  ;;  %v83_v45 = vld [vmem:[#allocation5 + $0x210] sm:$0xff]  ;;  %v88_v47 = vld [vmem:[#allocation5 + $0x248] sm:$0xff] }
  0x40   :  { %v1073_v50 = vpack.c.bf16 %v229_v42, %v228_v41  ;;  %v1031_v51 = vpack.c.bf16 %v85_v46, %v83_v45  ;;  %v1033_v52 = vpack.c.bf16 %v90_v48, %v88_v47  ;;  %v87_v53 = vld [vmem:[#allocation5 + $0x240] sm:$0xff]  ;;  %v92_v55 = vld [vmem:[#allocation5 + $0x278] sm:$0xff]  ;;  %v94_v56 = vld [vmem:[#allocation5 + $0x290] sm:$0xff] }
  0x41   :  { %v1037_v58 = vpack.c.bf16 %v94_v56, %v92_v55  ;;  %v93_v60 = vld [vmem:[#allocation5 + $0x288] sm:$0xff]  ;;  %v98_v62 = vld [vmem:[#allocation5 + $0x2c0] sm:$0xff]  ;;  %v97_v2 = vld [vmem:[#allocation5 + $0x2b8] sm:$0xff] }
  0x42   :  { %1012 = vmatpush1.bf16.msra.mxu0 %v1011_v54  ;;  %1064 = vmatpush3.bf16.msra.mxu1 %v1063_v24  ;;  %v89_v54 = vld [vmem:[#allocation5 + $0x258] sm:$0xff]  ;;  %v96_v61 = vld [vmem:[#allocation5 + $0x2a8] sm:$0xff]  ;;  %v95_v1 = vld [vmem:[#allocation5 + $0x2a0] sm:$0xff]  ;;  %v1260_v24 = vmov 0.0|0.0  }
  0x43   :  { %1014 = vmatprep.subr.bf16.mxu0 %v1013_v59  ;;  %1066 = vmatprep.subr.bf16.mxu1 %v1065_v25  ;;  %v1035_v57 = vpack.c.bf16 %v89_v54, %v87_v53  ;;  %v91_v59 = vld [vmem:[#allocation5 + $0x270] sm:$0xff]  ;;  %v1041_v0 = vpack.c.bf16 %v98_v62, %v96_v61  ;;  %v100_v3 = vld [vmem:[#allocation5 + $0x2d8] sm:$0xff]  ;;  %v1043_v5 = vpack.c.bf16 %v97_v2, %v95_v1  ;;  %v101_v8 = vld [vmem:[#allocation5 + $0x2e8] sm:$0xff] }
  0x44   :  { %v1039_v63 = vpack.c.bf16 %v93_v60, %v91_v59  ;;  %v212_v10 = vld [vmem:[#allocation5 + $0x438] sm:$0xff]  ;;  %v213_v11 = vld [vmem:[#allocation5 + $0x450] sm:$0xff]  ;;  %v230_v13 = vld [vmem:[#allocation5 + $0x5e8] sm:$0xff] }
  0x45   :  { %v1075_v12 = vpack.c.bf16 %v213_v11, %v212_v10  ;;  %v231_v14 = vld [vmem:[#allocation5 + $0x600] sm:$0xff]  ;;  %v308_v20 = vld [vmem:[#allocation5 + $0x650] sm:$0xff]  ;;  %v309_v23 = vld [vmem:[#allocation5 + $0x658] sm:$0xff] }
  0x46   :  { %1016 = vmatpush1.bf16.msra.mxu0 %v1015_v4  ;;  %1068 = vmatpush3.bf16.msra.mxu1 %v1067_v36  ;;  %v102_v4 = vld [vmem:[#allocation5 + $0x2f0] sm:$0xff]  ;;  %v1077_v15 = vpack.c.bf16 %v231_v14, %v230_v13  ;;  %v215_v17 = vld [vmem:[#allocation5 + $0x480] sm:$0xff]  ;;  %v315_v26 = vld [vmem:[#allocation5 + $0x688] sm:$0xff] }
  0x47   :  { %1018 = vmatprep.subr.bf16.mxu0 %v1017_v7  ;;  %1070 = vmatprep.subr.bf16.mxu1 %v1069_v37  ;;  %v1045_v6 = vpack.c.bf16 %v102_v4, %v100_v3  ;;  %v99_v7 = vld [vmem:[#allocation5 + $0x2d0] sm:$0xff]  ;;  %v306_v22 = vld [vmem:[#allocation5 + $0x640] sm:$0xff]  ;;  %v321_v29 = vld [vmem:[#allocation5 + $0x6b8] sm:$0xff] }
  0x48   :  { %v1047_v9 = vpack.c.bf16 %v101_v8, %v99_v7  ;;  %v312_v25 = vld [vmem:[#allocation5 + $0x670] sm:$0xff]  ;;  %v327_v32 = vld [vmem:[#allocation5 + $0x6e8] sm:$0xff]  ;;  %v330_v34 = vld [vmem:[#allocation5 + $0x700] sm:$0xff] }
  0x49   :  { %v1117_v27 = vpack.c.bf16 %v315_v26, %v312_v25  ;;  %v333_v35 = vld [vmem:[#allocation5 + $0x718] sm:$0xff]  ;;  %v336_v37 = vld [vmem:[#allocation5 + $0x730] sm:$0xff]  ;;  %v339_v38 = vld [vmem:[#allocation5 + $0x748] sm:$0xff] }
  0x4a   :  { %1020 = vmatpush1.bf16.msra.mxu0 %v1019_v16  ;;  %1072 = vmatpush3.bf16.msra.mxu1 %v1071_v49  ;;  %v214_v16 = vld [vmem:[#allocation5 + $0x468] sm:$0xff]  ;;  %v1126_v36 = vpack.c.bf16 %v333_v35, %v330_v34  ;;  %v1129_v39 = vpack.c.bf16 %v339_v38, %v336_v37  ;;  %v314_v55 = vld [vmem:[#allocation5 + $0x680] sm:$0xff]  ;;  %v313_v61 = vld [vmem:[#allocation5 + $0x678] sm:$0xff] }
  0x4b   :  { %1022 = vmatprep.subr.bf16.mxu0 %v1021_v19  ;;  %1074 = vmatprep.subr.bf16.mxu1 %v1073_v50  ;;  %v1079_v18 = vpack.c.bf16 %v215_v17, %v214_v16  ;;  %v305_v19 = vld [vmem:[#allocation5 + $0x638] sm:$0xff]  ;;  %v311_v54 = vld [vmem:[#allocation5 + $0x668] sm:$0xff]  ;;  %v310_v60 = vld [vmem:[#allocation5 + $0x660] sm:$0xff] }
  0x4c   :  { %v1081_v21 = vpack.c.bf16 %v308_v20, %v305_v19  ;;  %v1085_v59 = vpack.c.bf16 %v314_v55, %v311_v54  ;;  %v317_v62 = vld [vmem:[#allocation5 + $0x698] sm:$0xff]  ;;  %v316_v2 = vld [vmem:[#allocation5 + $0x690] sm:$0xff]  ;;  %v319_v3 = vld [vmem:[#allocation5 + $0x6a8] sm:$0xff] }
  0x4d   :  { %v323_v4 = vld [vmem:[#allocation5 + $0x6c8] sm:$0xff]  ;;  %v322_v8 = vld [vmem:[#allocation5 + $0x6c0] sm:$0xff]  ;;  %v329_v10 = vld [vmem:[#allocation5 + $0x6f8] sm:$0xff] }
  0x4e   :  { %1024 = vmatpush1.bf16.msra.mxu0 %v1023_v28  ;;  %1076 = vmatpush3.bf16.msra.mxu1 %v1075_v12  ;;  %v318_v28 = vld [vmem:[#allocation5 + $0x6a0] sm:$0xff]  ;;  %v332_v11 = vld [vmem:[#allocation5 + $0x710] sm:$0xff]  ;;  %v335_v16 = vld [vmem:[#allocation5 + $0x728] sm:$0xff] }
  0x4f   :  { %1026 = vmatprep.subr.bf16.mxu0 %v1025_v31  ;;  %1078 = vmatprep.subr.bf16.mxu1 %v1077_v15  ;;  %v1120_v30 = vpack.c.bf16 %v321_v29, %v318_v28  ;;  %v324_v31 = vld [vmem:[#allocation5 + $0x6d0] sm:$0xff]  ;;  %v1097_v13 = vpack.c.bf16 %v332_v11, %v329_v10  ;;  %v331_v15 = vld [vmem:[#allocation5 + $0x708] sm:$0xff]  ;;  %v338_v17 = vld [vmem:[#allocation5 + $0x740] sm:$0xff] }
  0x50   :  { %v1123_v33 = vpack.c.bf16 %v327_v32, %v324_v31  ;;  %v328_v14 = vld [vmem:[#allocation5 + $0x6f0] sm:$0xff]  ;;  %v1101_v19 = vpack.c.bf16 %v338_v17, %v335_v16  ;;  %v334_v20 = vld [vmem:[#allocation5 + $0x720] sm:$0xff]  ;;  %v347_v32 = vld [vmem:[#allocation5 + $0x788] sm:$0xff] }
  0x51   :  { %v340_v26 = vld [vmem:[#allocation5 + $0x750] sm:$0xff]  ;;  %v342_v29 = vld [vmem:[#allocation5 + $0x760] sm:$0xff]  ;;  %v513_v55 = vld [vmem:[#allocation5 + $0x7f8] sm:$0xff] }
  0x52   :  { %1028 = vmatpush1.bf16.msra.mxu0 %v1027_v40  ;;  %1080 = vmatpush3.bf16.msra.mxu1 %v1079_v18  ;;  %v106_v40 = vlaneseq  ;;  %v1099_v18 = vpack.c.bf16 %v331_v15, %v328_v14  ;;  %v346_v35 = vld [vmem:[#allocation5 + $0x780] sm:$0xff]  ;;  %v348_v38 = vld [vmem:[#allocation5 + $0x790] sm:$0xff] }
  0x53   :  { %1030 = vmatprep.subr.bf16.mxu0 %v1029_v44  ;;  %1082 = vmatprep.subr.bf16.mxu1 %v1081_v21  ;;  %v104_v44 = vld [vmem:[#allocation5 + $0x300] ss:$8 sm:$0x3]  ;;  %v337_v21 = vld [vmem:[#allocation5 + $0x738] sm:$0xff] }
  0x54   :  { %v1325_v41 = vshrl.u32 %v106_v40, 7 }
  0x56   :  { %1032 = vmatpush1.bf16.msra.mxu0 %v1031_v51  ;;  %v108_v42 = vsub.s32 0, %v1325_v41  ;;  %v112_v45 = vsub.s32 1, %v1325_v41  ;;  %v304_v51 = vld [vmem:[#allocation5 + $0x630] sm:$0xff] }
  0x57   :  { %1034 = vmatprep.subr.bf16.mxu0 %v1033_v52  ;;  %v307_v52 = vld [vmem:[#allocation5 + $0x648] sm:$0xff] }
  0x58   :  { %v109_v46 = vrot.slane %v104_v44, %v108_v42  ;;  %v113_v47 = vrot.slane %v104_v44, %v112_v45  ;;  %v1261_v44 = vmov 0.0  }
  0x5a   :  { %1036 = vmatpush1.bf16.msra.mxu0 %v1035_v57  ;;  %v1083_v57 = vpack.c.bf16 %v307_v52, %v304_v51  ;;  %v512_v51 = vld [vmem:[#allocation5 + $0x7e0] sm:$0xff] }
  0x5b   :  { %1038 = vmatprep.subr.bf16.mxu0 %v1037_v58 }
  0x5e   :  { %1040 = vmatpush1.bf16.msra.mxu0 %v1039_v63  ;;  %v320_v63 = vld [vmem:[#allocation5 + $0x6b0] sm:$0xff] }
  0x5f   :  { %1042 = vmatprep.subr.bf16.mxu0 %v1041_v0  ;;  %v1087_v0 = vpack.c.bf16 %v313_v61, %v310_v60  ;;  %v1089_v1 = vpack.c.bf16 %v320_v63, %v317_v62  ;;  %v1349_v62 = vld [vmem:[#allocation5 + $0x828] ss:$0 sm:$0xff] }
  0x62   :  { %1044 = vmatpush1.bf16.msra.mxu0 %v1043_v5  ;;  %v326_v5 = vld [vmem:[#allocation5 + $0x6e0] sm:$0xff] }
  0x63   :  { %1046 = vmatprep.subr.bf16.mxu0 %v1045_v6  ;;  %v1091_v6 = vpack.c.bf16 %v319_v3, %v316_v2  ;;  %v1093_v7 = vpack.c.bf16 %v326_v5, %v323_v4  ;;  %v1353_v2 = vld [vmem:[#allocation5 + $0x7b0] ss:$8 sm:$0x7] }
  0x64   :  { %v358_v3 = vrot.slane %v1353_v2, %v108_v42 }
  0x66   :  { %1048 = vmatpush1.bf16.msra.mxu0 %v1047_v9  ;;  %v325_v9 = vld [vmem:[#allocation5 + $0x6d8] sm:$0xff] }
  0x67   :  { %1113 = vmatprep.subr.bf16.mxu0 %v1260_v24  ;;  %v1095_v12 = vpack.c.bf16 %v325_v9, %v322_v8 }
  0x69   :  { %192 = vmatmul.mubr.f32.vlgmr.msra.gmra.mrb[0].mxu0 %v1313_v43  ;;  %v1114_v43 = vpack.c.bf16 %v309_v23, %v306_v22  ;;  %v341_v22 = vld [vmem:[#allocation5 + $0x758] sm:$0xff]  ;;  %v344_v23 = vld [vmem:[#allocation5 + $0x770] sm:$0xff] }
  0x6a   :  { %v1105_v25 = vpack.c.bf16 %v344_v23, %v341_v22  ;;  %949 = vmatprep.mubr.msk.f32.mxu0 %vm1262_vm0, %v1261_v44  ;;  %v362_v23 = vrot.slane %v1353_v2, %v112_v45 }
  0x6b   :  { %1115 = vmatpush3.bf16.msra.mxu0 %v1114_v43  ;;  %v1103_v43 = vpack.c.bf16 %v337_v21, %v334_v20 }
  0x6c   :  { %1116 = vmatprep.subr.bf16.mxu0 %v1260_v24 }
  0x6f   :  { %1118 = vmatpush3.bf16.msra.mxu0 %v1117_v27  ;;  %v343_v27 = vld [vmem:[#allocation5 + $0x768] sm:$0xff] }
  0x70   :  { %1119 = vmatprep.subr.bf16.mxu0 %v1260_v24  ;;  %v1107_v28 = vpack.c.bf16 %v343_v27, %v340_v26 }
  0x73   :  { %1121 = vmatpush3.bf16.msra.mxu0 %v1120_v30  ;;  %v345_v30 = vld [vmem:[#allocation5 + $0x778] sm:$0xff] }
  0x74   :  { %1122 = vmatprep.subr.bf16.mxu0 %v1260_v24  ;;  %v1132_v31 = vpack.c.bf16 %v345_v30, %v342_v29 }
  0x77   :  { %1124 = vmatpush3.bf16.msra.mxu0 %v1123_v33  ;;  %v350_v33 = vld [vmem:[#allocation5 + $0x7a0] sm:$0xff] }
  0x78   :  { %1125 = vmatprep.subr.bf16.mxu0 %v1260_v24  ;;  %v1109_v34 = vpack.c.bf16 %v350_v33, %v347_v32 }
  0x7b   :  { %1127 = vmatpush3.bf16.msra.mxu0 %v1126_v36  ;;  %v349_v36 = vld [vmem:[#allocation5 + $0x798] sm:$0xff] }
  0x7c   :  { %1128 = vmatprep.subr.bf16.mxu0 %v1260_v24  ;;  %v1111_v37 = vpack.c.bf16 %v349_v36, %v346_v35 }
  0x7f   :  { %1130 = vmatpush3.bf16.msra.mxu0 %v1129_v39  ;;  %v351_v39 = vld [vmem:[#allocation5 + $0x7a8] sm:$0xff] }
  0x80   :  { %1131 = vmatprep.subr.bf16.mxu0 %v1260_v24  ;;  %v1135_v40 = vpack.c.bf16 %v351_v39, %v348_v38 }
  0x83   :  { %1133 = vmatpush3.bf16.msra.mxu0 %v1132_v31 }
  0x84   :  { %1134 = vmatprep.subr.bf16.mxu0 %v1260_v24 }
  0x87   :  { %1136 = vmatpush3.bf16.msra.mxu0 %v1135_v40 }
 0x13c   :  { %v193_v48 = vpop.f32.mrb[0].mxu0 }
 0x13d   :  { %v194_v49 = vadd.f32 %v193_v48, %v109_v46  ;;  %v195_v50 = vpop.f32.mrb[1].mxu0 }
 0x13e   :  { %v196_v53 = vadd.f32 %v195_v50, %v113_v47  ;;  %v232_v47 = vld [vmem:[#allocation5 + $0x618] ss:$0 sm:$0xff]  ;;  %v511_v50 = vld [vmem:[#allocation5 + $0x7c8] sm:$0xff] }
 0x13f   :  { %v198_v58 = vmax.f32 %v194_v49, 0.0 }
 0x140   :  { %v199_v56 = vmax.f32 %v196_v53, 0.0  ;;  %v1138_v53 = vpack.c.bf16 %v512_v51, %v511_v50 }
 0x142   :  { %297 = vmatprep.mubr.f32.mxu1 %v199_v56  ;;  %v514_v56 = vld [vmem:[#allocation5 + $0x810] sm:$0xff] }
 0x143   :  { %298 = vmatmul.mubr.f32.vlgmr.msra.gmra.mrb[0].mxu1 %v198_v58 }
 0x144   :  { %1084 = vmatpush1.bf16.msra.mxu1 %v1083_v57  ;;  %434 = vmatprep.mubr.f32.mxu1 %v1261_v44  ;;  %v1141_v57 = vpack.c.bf16 %v514_v56, %v513_v55 }
 0x145   :  { %1086 = vmatprep.subr.bf16.mxu1 %v1085_v59 }
 0x148   :  { %1088 = vmatpush1.bf16.msra.mxu1 %v1087_v0 }
 0x149   :  { %1090 = vmatprep.subr.bf16.mxu1 %v1089_v1 }
 0x14c   :  { %1092 = vmatpush1.bf16.msra.mxu1 %v1091_v6 }
 0x14d   :  { %1094 = vmatprep.subr.bf16.mxu1 %v1093_v7 }
 0x150   :  { %1096 = vmatpush1.bf16.msra.mxu1 %v1095_v12 }
 0x151   :  { %1098 = vmatprep.subr.bf16.mxu1 %v1097_v13 }
 0x154   :  { %1100 = vmatpush1.bf16.msra.mxu1 %v1099_v18 }
 0x155   :  { %1102 = vmatprep.subr.bf16.mxu1 %v1101_v19 }
 0x158   :  { %1104 = vmatpush1.bf16.msra.mxu1 %v1103_v43 }
 0x159   :  { %1106 = vmatprep.subr.bf16.mxu1 %v1105_v25 }
 0x15c   :  { %1108 = vmatpush1.bf16.msra.mxu1 %v1107_v28 }
 0x15d   :  { %1110 = vmatprep.subr.bf16.mxu1 %v1109_v34 }
 0x160   :  { %1112 = vmatpush1.bf16.msra.mxu1 %v1111_v37 }
 0x161   :  { %1137 = vmatprep.subr.bf16.mxu1 %v1260_v24 }
 0x216   :  { %v882_v46 = vpop.f32.mrb[0].mxu1 }
 0x217   :  { %v883_v48 = vpop.f32.mrb[1].mxu1 }
 0x218   :  { %v884_v49 = vadd.f32 %v883_v48, %v882_v46  ;;  %v365_v46 = vsub.s32 2, %v1325_v41 }
 0x21a   :  { %v300_v52 = vadd.f32 %v884_v49, %v232_v47  ;;  %v366_v47 = vrot.slane %v1353_v2, %v365_v46 }
 0x21c   :  { %v303_v54 = vmax.f32 %v300_v52, 0.0 }
 0x21e   :  { %435 = vmatmul.mubr.f32.vlgmr.msra.gmra.mrb[2].mxu1 %v303_v54  ;;  %950 = vmatmul.mubr.f32.vlgmr.msra.gmra.mrb[2].mxu0 %v303_v54 }
 0x21f   :  { %1139 = vmatpush3.bf16.msra.mxu1 %v1138_v53  ;;  %960 = vmatprep.mubr.msk.f32.mxu1 %vm1262_vm0, %v1261_v44 }
 0x220   :  { %1140 = vmatprep.subr.bf16.mxu1 %v1260_v24 }
 0x223   :  { %1142 = vmatpush3.bf16.msra.mxu1 %v1141_v57 }
 0x224   :  { %1143 = vmatprep.subr.bf16.mxu1 %v1260_v24 }
 0x226   :  { %961 = vmatmul.mubr.f32.vlgmr.msra.gmra.mrb[4].mxu1 %v1261_v44 }
 0x227   :  { %1145 = vmatpush3.bf16.msra.mxu1 %v1138_v53  ;;  %971 = vmatprep.mubr.msk.f32.mxu1 %vm1262_vm0, %v1261_v44 }
 0x228   :  { %1146 = vmatprep.subr.bf16.mxu1 %v1260_v24 }
 0x22b   :  { %1148 = vmatpush3.bf16.msra.mxu1 %v1141_v57 }
 0x22c   :  { %1149 = vmatprep.subr.bf16.mxu1 %v1260_v24 }
 0x2f1   :  { %v436_v58 = vpop.f32.mrb[2].mxu1  ;;  %v1347_v59 = vpop.f32.mrb[2].mxu0 }
 0x2f2   :  { %v438_v60 = vpop.f32.mrb[3].mxu1  ;;  %v951_v61 = vpop.f32.mrb[3].mxu0  ;;  %v437_v4 = vadd.f32 %v436_v58, %v358_v3  ;;  %v508_v48 = vadd.f32 %v1347_v59, %v366_v47 }
 0x2f3   :  { %v439_v43 = vadd.f32 %v438_v60, %v362_v23 }
 0x2f9   :  { %v586_v63 = vpop.f32.mrb[4].mxu1 }
 0x2fa   :  { %v587_v0 = vadd.f32 %v586_v63, %v1349_v62  ;;  %v962_v1 = vpop.f32.mrb[5].mxu1 }
 0x2fc   :  { %598 = vrot.lane.b32.xlu0 %v587_v0, %s1263_s1  ;;  %v590_v5 = vadd.f32 %v587_v0, %v437_v4 }
 0x2fe   :  { %v845_v6 = vmul.f32 -1.442695, %v590_v5 }
 0x300   :  { %1166 = vpow2.f32 %v845_v6 }
 0x30a   :  { %v1167_v7 = vpop.eup %1166 }
 0x30b   :  { %v594_v8 = vadd.f32 1.0, %v1167_v7 }
 0x30d   :  { %1168 = vrcp.f32 %v594_v8 }
 0x317   :  { %v1169_v9 = vpop.eup %1168 }
 0x318   :  { %v608_v42 = vsub.f32 1.0, %v1169_v9  ;;  %v614_v16 = vmul.f32 0.0, %v1169_v9 }
 0x36e   :  { %v599_v10 = vpop.permute.xlu0 %598 }
 0x36f   :  { %v601_v11 = vmul.f32 %v1169_v9, %v599_v10 }
 0x371   :  { %603 = vrot.lane.b32.xlu0 %v601_v11, %s1263_s1 }
 0x3e3   :  { %v604_v12 = vpop.permute.xlu0 %603 }
 0x3e4   :  { %v606_v13 = vadd.f32 %v604_v12, %v437_v4 }
 0x3e6   :  { %1170 = vtanh.f32 %v606_v13 }
 0x3f0   :  { %v1171_v14 = vpop.eup %1170 }
 0x3f1   :  { %610 = vrot.lane.b32.xlu1 %v1171_v14, %s1264_s6 }
 0x463   :  { %v611_v15 = vpop.permute.xlu1 %610 }
 0x464   :  { %v613_v17 = vmul.f32 %v611_v15, %v608_v42 }
 0x466   :  { %v615_v18 = vadd.f32 %v614_v16, %v613_v17 }
 0x468   :  { %617 = vrot.lane.b32.xlu1 %v615_v18, %s1264_s6 }
 0x4da   :  { %v1361_v19 = vpop.permute.xlu1 %617 }
 0x4db   :  { %972 = vmatmul.mubr.msk.f32.vlgmr.msra.gmra.mrb[6].mxu1 %vm516_vm1, %v1361_v19 }
 0x4dc   :  { %1151 = vmatpush3.bf16.msra.mxu1 %v1138_v53  ;;  %982 = vmatprep.mubr.msk.f32.mxu1 %vm1262_vm0, %v1261_v44 }
 0x4dd   :  { %1152 = vmatprep.subr.bf16.mxu1 %v1260_v24 }
 0x4e0   :  { %1154 = vmatpush3.bf16.msra.mxu1 %v1141_v57 }
 0x5ae   :  { %v687_v20 = vpop.f32.mrb[6].mxu1 }
 0x5af   :  { %v688_v21 = vadd.f32 %v687_v20, %v1349_v62  ;;  %v973_v22 = vpop.f32.mrb[7].mxu1 }
 0x5b1   :  { %699 = vrot.lane.b32.xlu0 %v688_v21, %s1263_s1  ;;  %v691_v25 = vadd.f32 %v688_v21, %v439_v43 }
 0x5b3   :  { %v847_v26 = vmul.f32 -1.442695, %v691_v25 }
 0x5b5   :  { %1172 = vpow2.f32 %v847_v26 }
 0x5bf   :  { %v1173_v27 = vpop.eup %1172 }
 0x5c0   :  { %v695_v28 = vadd.f32 1.0, %v1173_v27 }
 0x5c2   :  { %1174 = vrcp.f32 %v695_v28 }
 0x5cc   :  { %v1175_v29 = vpop.eup %1174 }
 0x5cd   :  { %v709_v34 = vsub.f32 1.0, %v1175_v29  ;;  %v715_v35 = vmul.f32 %v1175_v29, %v615_v18 }
 0x623   :  { %v700_v24 = vpop.permute.xlu0 %699 }
 0x624   :  { %v702_v30 = vmul.f32 %v1175_v29, %v700_v24 }
 0x626   :  { %704 = vrot.lane.b32.xlu1 %v702_v30, %s1263_s1 }
 0x698   :  { %v705_v31 = vpop.permute.xlu1 %704 }
 0x699   :  { %v707_v32 = vadd.f32 %v705_v31, %v439_v43 }
 0x69b   :  { %1176 = vtanh.f32 %v707_v32 }
 0x6a5   :  { %v1177_v33 = vpop.eup %1176 }
 0x6a6   :  { %711 = vrot.lane.b32.xlu0 %v1177_v33, %s1264_s6 }
 0x718   :  { %v712_v45 = vpop.permute.xlu0 %711 }
 0x719   :  { %v714_v36 = vmul.f32 %v712_v45, %v709_v34 }
 0x71b   :  { %v716_v37 = vadd.f32 %v715_v35, %v714_v36 }
 0x71d   :  { %718 = vrot.lane.b32.xlu1 %v716_v37, %s1264_s6  ;;  %v823_v63 = vsel %vm516_vm1, %v1361_v19, %v716_v37 }
 0x78f   :  { %v719_v38 = vpop.permute.xlu1 %718 }
 0x790   :  { %983 = vmatmul.mubr.msk.f32.vlgmr.msra.gmra.mrb[8].mxu1 %vm516_vm1, %v719_v38 }
 0x863   :  { %v788_v39 = vpop.f32.mrb[8].mxu1 }
 0x864   :  { %v789_v40 = vadd.f32 %v788_v39, %v1349_v62  ;;  %v984_v44 = vpop.f32.mrb[9].mxu1 }
 0x866   :  { %800 = vrot.lane.b32.xlu0 %v789_v40, %s1263_s1  ;;  %v792_v49 = vadd.f32 %v789_v40, %v508_v48 }
 0x868   :  { %v849_v50 = vmul.f32 -1.442695, %v792_v49 }
 0x86a   :  { %1178 = vpow2.f32 %v849_v50 }
 0x874   :  { %v1179_v51 = vpop.eup %1178 }
 0x875   :  { %v796_v52 = vadd.f32 1.0, %v1179_v51 }
 0x877   :  { %1180 = vrcp.f32 %v796_v52 }
 0x881   :  { %v1181_v53 = vpop.eup %1180 }
 0x882   :  { %v810_v41 = vsub.f32 1.0, %v1181_v53  ;;  %v816_v59 = vmul.f32 %v1181_v53, %v716_v37 }
 0x8d8   :  { %v801_v54 = vpop.permute.xlu0 %800 }
 0x8d9   :  { %v803_v55 = vmul.f32 %v1181_v53, %v801_v54 }
 0x8db   :  { %805 = vrot.lane.b32.xlu1 %v803_v55, %s1263_s1 }
 0x94d   :  { %v806_v56 = vpop.permute.xlu1 %805 }
 0x94e   :  { %v808_v57 = vadd.f32 %v806_v56, %v508_v48 }
 0x950   :  { %1182 = vtanh.f32 %v808_v57 }
 0x95a   :  { %v1183_v58 = vpop.eup %1182 }
 0x95b   :  { %812 = vrot.lane.b32.xlu0 %v1183_v58, %s1264_s6 }
 0x9cd   :  { %v813_v60 = vpop.permute.xlu0 %812 }
 0x9ce   :  { %v815_v61 = vmul.f32 %v813_v60, %v810_v41 }
 0x9d0   :  { %v817_v62 = vadd.f32 %v816_v59, %v815_v61 }
 0x9d2   :  { %820 = vrot.lane.b32.xlu1 %v817_v62, %s1265_s7 }
 0xa44   :  { %v821_v0 = vpop.permute.xlu1 %820 }
 0xa45   :  { %v825_v1 = vsel %vm824_vm2, %v823_v63, %v821_v0 }
 0xa46   :  { %827 = vst.msk [vmem:[#allocation7] sm:$0x3] %vm826_vm3, %v825_v1 }
 0xa47   :  { %1239 = shalt.err (!%p1236_p6)
}
 0xa48   :  { %s1240_s13 = scalar_lea.hbm %s1400_s2, 32 }
 0xa49   :  { %p1241_p7 = scmp.ne.s32.totalorder %s1400_s2, %s1240_s13  ;;  %p1244_p8 = scmp.lt.u32.totalorder %s1240_s13, %s1400_s2 }
 0xa4b   :  { %p1246_p9 = pnand %p1244_p8, %p1241_p7 }
 0xa4d   :  { %1249 = shalt.err (!%p1246_p9)
}
 0xa4e   :  { %837 = dma.vmem_to_hbm [thread:$0]  %s835_s9, 32, %s1400_s2, [#allocation4]  }
 0xa4f   :  { %1254 = dma.done.wait [#allocation4], 32  }
 0xa50   :  { %1255 = vsyncadd [#allocation4], 4294967264 }
 0xa51   :  { %841 = vsyncpa [#allocation3], 1 }
 0xa52   :  { %842 = vsyncpa [#allocation6], 1 }
 0xa53   :  { %843 = vsyncpa [#allocation4], 1 }

</bundles_post_ra>
